<compile_context>
chip_gen: v5e
topology: v5e:2x2
jax: 0.10.0
libtpu: 0.0.40
codegen_flags: <defaults>
</compile_context>

<pallas_src>
import functools
import numpy as np
import jax
import jax.numpy as jnp
from jax.experimental import pallas as pl
from jax.experimental.pallas import tpu as pltpu

NODE_OUT = 2                                            # default node_out
FC_OUT = NODE_OUT * 2 + (NODE_OUT ** 2 - NODE_OUT) // 2  # = 5


# ----------------------------------------------------------------------------
# nodeframe.decreasingNode equivalent (geometric interpolation of node counts)
# ----------------------------------------------------------------------------
def decreasing_node(node_in, node_out, hidden_layer):
    factor = (node_in / node_out) ** (1.0 / (hidden_layer + 1))
    return [int(round(node_in / factor ** i)) for i in range(hidden_layer + 2)]


# ----------------------------------------------------------------------------
# Fused Pallas kernel: whole network in one launch
# ----------------------------------------------------------------------------
def _fused_mlp_kernel(*refs, num_layers):
    """refs = (x, W0, b0, ..., W_{L-1}, b_{L-1}, P_lin, P_sp, out_slab).

    Layers 0..L-2:  h = softplus(h @ W + b)   (Linear -> folded BN -> Softplus)
    Layer  L-1:     y = h @ W + b             (final trunk linear, no act)
                    slab = y @ P_lin + softplus(y) @ P_sp
    """
    x_ref = refs[0]
    p_lin_ref = refs[1 + 2 * num_layers]
    p_sp_ref = refs[2 + 2 * num_layers]
    o_ref = refs[3 + 2 * num_layers]

    h = x_ref[...]
    for l in range(num_layers):
        w = refs[1 + 2 * l][...]
        b = refs[2 + 2 * l][...]                 # (1, N) broadcasts over batch
        y = jnp.dot(h, w, preferred_element_type=jnp.float32) + b
        if l + 1 < num_layers:
            h = jnp.logaddexp(y, 0.0)            # Softplus
        else:
            sp = jnp.logaddexp(y, 0.0)           # softplus of all 5 cols (EUP, cheap)
            slab = (jnp.dot(y, p_lin_ref[...], preferred_element_type=jnp.float32)
                    + jnp.dot(sp, p_sp_ref[...], preferred_element_type=jnp.float32))
            o_ref[...] = slab.astype(o_ref.dtype)


# ----------------------------------------------------------------------------
# Host-side packing: block-diagonal branch weights + head selection matrices
# ----------------------------------------------------------------------------
def _block_diag(mats):
    rows = sum(m.shape[0] for m in mats)
    cols = sum(m.shape[1] for m in mats)
    out = jnp.zeros((rows, cols), jnp.float32)
    r = c = 0
    for m in mats:
        out = out.at[r:r + m.shape[0], c:c + m.shape[1]].set(m)
        r += m.shape[0]
        c += m.shape[1]
    return out


def _build_head_mats(node_out):
    """0/1 selection matrices mapping the (B, fc_out) trunk output to the
    (B, node_out + node_out^2) output slab = [params | chol row-major]."""
    fc_out = node_out * 2 + (node_out ** 2 - node_out) // 2
    slab_w = node_out + node_out * node_out
    p_lin = np.zeros((fc_out, slab_w), np.float32)
    p_sp = np.zeros((fc_out, slab_w), np.float32)
    for k in range(node_out):                    # params pass-through
        p_lin[k, k] = 1.0
    for k in range(node_out):                    # softplus diagonal of chol
        p_sp[node_out + k, node_out + k * node_out + k] = 1.0
    iu_r, iu_c = np.triu_indices(node_out, 1)    # upper off-diagonal (linear)
    for idx, (r, c) in enumerate(zip(iu_r, iu_c)):
        p_lin[2 * node_out + idx, node_out + r * node_out + c] = 1.0
    return jnp.asarray(p_lin), jnp.asarray(p_sp)


def pack_params(params, node_out=NODE_OUT):
    """Pack per-branch layers into block-diagonal layers + append trunk."""
    branches = params["branches"]
    trunk = params["trunk"]
    depth = len(branches[0])                     # same depth for every branch
    layers = []
    for d in range(depth):
        Ws = [branches[i][d][0] for i in range(len(branches))]
        bs = [branches[i][d][1] for i in range(len(branches))]
        layers.append((_block_diag(Ws), jnp.concatenate(bs, axis=1)))
    layers.extend(trunk)
    p_lin, p_sp = _build_head_mats(node_out)
    return {"layers": layers, "head": (p_lin, p_sp), "node_out": node_out}


# ----------------------------------------------------------------------------
# Forward pass: one pallas_call
# ----------------------------------------------------------------------------
def forward_pallas(x_all, packed, batch_tile=1024):
    layers = packed["layers"]
    p_lin, p_sp = packed["head"]
    node_out = packed["node_out"]
    slab_w = p_lin.shape[1]

    x = jnp.concatenate([jnp.asarray(xi, jnp.float32) for xi in x_all], axis=1)
    B = x.shape[0]

    # Batch tiling: tiny batches -> single full block; large batches -> grid
    # over 8-aligned tiles (activation buffers ~0.5 MB/tile, well inside v7x
    # 64 MiB VMEM), weights stay resident via index_map (0, 0).
    if B <= batch_tile:
        bm, Bp = B, B
    else:
        bm = batch_tile                                  # multiple of 8
        Bp = ((B + bm - 1) // bm) * bm
        if Bp != B:
            x = jnp.pad(x, ((0, Bp - B), (0, 0)))
    grid = (Bp // bm,)

    in_specs = [pl.BlockSpec((bm, x.shape[1]), lambda i: (i, 0))]
    inputs = [x]
    for (W, b) in layers:
        in_specs.append(pl.BlockSpec(W.shape, lambda i: (0, 0)))   # resident
        in_specs.append(pl.BlockSpec(b.shape, lambda i: (0, 0)))   # resident
        inputs.extend([W, b])
    in_specs.append(pl.BlockSpec(p_lin.shape, lambda i: (0, 0)))
    in_specs.append(pl.BlockSpec(p_sp.shape, lambda i: (0, 0)))
    inputs.extend([p_lin, p_sp])

    slab = pl.pallas_call(
        functools.partial(_fused_mlp_kernel, num_layers=len(layers)),
        out_shape=jax.ShapeDtypeStruct((Bp, slab_w), jnp.float32),
        grid=grid,
        in_specs=in_specs,
        out_specs=pl.BlockSpec((bm, slab_w), lambda i: (i, 0)),
        compiler_params=pltpu.CompilerParams(
            dimension_semantics=("parallel",)),   # shards batch across v7x TCs
    )(*inputs)

    slab = slab[:B]
    params_out = slab[:, :node_out].reshape(B, node_out, 1)
    chol = slab[:, node_out:node_out + node_out * node_out].reshape(
        B, node_out, node_out)
    return params_out, chol


# ----------------------------------------------------------------------------
# Parameter construction (deterministic, BN folded into Linear)
# ----------------------------------------------------------------------------
def init_linear_bn(key, n_in, n_out, with_bn):
    k = jax.random.split(key, 6)
    W = jax.random.normal(k[0], (n_in, n_out), jnp.float32) / np.sqrt(n_in)
    b = 0.01 * jax.random.normal(k[1], (n_out,), jnp.float32)
    if with_bn:  # eval-mode BatchNorm1d folded: y = gamma*(x-mu)/sqrt(var+eps)+beta
        gamma = 1.0 + 0.1 * jax.random.normal(k[2], (n_out,), jnp.float32)
        beta = 0.1 * jax.random.normal(k[3], (n_out,), jnp.float32)
        mu = 0.1 * jax.random.normal(k[4], (n_out,), jnp.float32)
        var = jnp.abs(jax.random.normal(k[5], (n_out,), jnp.float32)) + 0.5
        scale = gamma / jnp.sqrt(var + 1e-5)
        W = W * scale[None, :]
        b = (b - mu) * scale + beta
    return W.astype(jnp.float32), b.reshape(1, n_out).astype(jnp.float32)


def build_params(key, nodes_in, branch_hiddenLayer=1, trunk_hiddenLayer=1):
    fc_hidden = branch_hiddenLayer * 2 + 1
    nodes_all, branches_out = [], []
    for nin in nodes_in:
        fc_node = decreasing_node(nin, FC_OUT, fc_hidden)
        nb = fc_node[:branch_hiddenLayer + 2]
        nodes_all.append(nb)
        branches_out.append(nb[-1])
    nodes_all.append(decreasing_node(sum(branches_out), FC_OUT, trunk_hiddenLayer))

    params = {"branches": [], "trunk": []}
    for nb in nodes_all[:-1]:
        layers = []
        for j in range(len(nb) - 1):
            key, sub = jax.random.split(key)
            layers.append(init_linear_bn(sub, nb[j], nb[j + 1], with_bn=True))
        params["branches"].append(layers)
    nt = nodes_all[-1]
    for j in range(len(nt) - 1):
        key, sub = jax.random.split(key)
        is_last = (j == len(nt) - 2)
        params["trunk"].append(init_linear_bn(sub, nt[j], nt[j + 1],
                                              with_bn=not is_last))
    return params


# ----------------------------------------------------------------------------
# Pure-JAX reference (unpacked, per-branch) for correctness checking
# ----------------------------------------------------------------------------
def forward_ref(x_all, params):
    branch_outs = []
    for i, x in enumerate(x_all):
        h = x
        for (W, b) in params["branches"][i]:
            h = jnp.logaddexp(h @ W + b, 0.0)
        branch_outs.append(h)
    x = jnp.concatenate(branch_outs, axis=1)
    trunk = params["trunk"]
    for j, (W, b) in enumerate(trunk):
        x = x @ W + b
        if j != len(trunk) - 1:
            x = jnp.logaddexp(x, 0.0)
    B = x.shape[0]
    p = x[:, :NODE_OUT].reshape(B, NODE_OUT, 1)
    d = jnp.logaddexp(x[:, NODE_OUT:2 * NODE_OUT], 0.0)
    off = x[:, 2 * NODE_OUT:]
    c = jnp.zeros((B, NODE_OUT, NODE_OUT), jnp.float32)
    c = c.at[:, 0, 0].set(d[:, 0]).at[:, 1, 1].set(d[:, 1]).at[:, 0, 1].set(off[:, 0])
    return p, c


# ----------------------------------------------------------------------------
if __name__ == "__main__":
    nodes_in = [24, 20, 16]          # small shapes consistent with the module
    batch = 4

    key = jax.random.PRNGKey(0)
    key_p, key_x = jax.random.split(key)
    params = build_params(key_p, nodes_in)
    packed = pack_params(params)

    x_keys = jax.random.split(key_x, len(nodes_in))
    x_all = [jax.random.normal(x_keys[i], (batch, nodes_in[i]), jnp.float32)
             for i in range(len(nodes_in))]

    p_out, c_out = forward_pallas(x_all, packed)
    p_out = jax.block_until_ready(p_out)
    c_out = jax.block_until_ready(c_out)

    p_ref, c_ref = forward_ref(x_all, params)
    assert p_out.shape == (batch, NODE_OUT, 1)
    assert c_out.shape == (batch, NODE_OUT, NODE_OUT)
    np.testing.assert_allclose(np.asarray(p_out), np.asarray(p_ref),
                               rtol=1e-4, atol=1e-5)
    np.testing.assert_allclose(np.asarray(c_out), np.asarray(c_ref),
                               rtol=1e-4, atol=1e-5)

    print("KERNEL_OK")
</pallas_src>

<mosaic_0001>
module attributes {stable_mosaic.version = 11 : i64} {
  func.func @_fused_mlp_kernel(%arg0: i32, %arg1: memref<4x60xf32, #tpu.memory_space<vmem>>, %arg2: memref<60x42xf32, #tpu.memory_space<vmem>>, %arg3: memref<1x42xf32, #tpu.memory_space<vmem>>, %arg4: memref<42x30xf32, #tpu.memory_space<vmem>>, %arg5: memref<1x30xf32, #tpu.memory_space<vmem>>, %arg6: memref<30x12xf32, #tpu.memory_space<vmem>>, %arg7: memref<1x12xf32, #tpu.memory_space<vmem>>, %arg8: memref<12x5xf32, #tpu.memory_space<vmem>>, %arg9: memref<1x5xf32, #tpu.memory_space<vmem>>, %arg10: memref<5x6xf32, #tpu.memory_space<vmem>>, %arg11: memref<5x6xf32, #tpu.memory_space<vmem>>, %arg12: memref<4x6xf32, #tpu.memory_space<vmem>>) attributes {dimension_semantics = [#tpu.dimension_semantics<parallel>], iteration_bounds = array<i64: 1>, scalar_prefetch = 0 : i64, scratch_operands = 0 : i64, tpu.core_type = #tpu.core_type<tc>, window_params = [{transform_indices = @transform_0, window_bounds = array<i64: 4, 60>}, {pipeline_mode = #tpu.pipeline_mode<synchronous>, transform_indices = @transform_1, window_bounds = array<i64: 60, 42>}, {pipeline_mode = #tpu.pipeline_mode<synchronous>, transform_indices = @transform_2, window_bounds = array<i64: 1, 42>}, {pipeline_mode = #tpu.pipeline_mode<synchronous>, transform_indices = @transform_3, window_bounds = array<i64: 42, 30>}, {pipeline_mode = #tpu.pipeline_mode<synchronous>, transform_indices = @transform_4, window_bounds = array<i64: 1, 30>}, {pipeline_mode = #tpu.pipeline_mode<synchronous>, transform_indices = @transform_5, window_bounds = array<i64: 30, 12>}, {pipeline_mode = #tpu.pipeline_mode<synchronous>, transform_indices = @transform_6, window_bounds = array<i64: 1, 12>}, {pipeline_mode = #tpu.pipeline_mode<synchronous>, transform_indices = @transform_7, window_bounds = array<i64: 12, 5>}, {pipeline_mode = #tpu.pipeline_mode<synchronous>, transform_indices = @transform_8, window_bounds = array<i64: 1, 5>}, {pipeline_mode = #tpu.pipeline_mode<synchronous>, transform_indices = @transform_9, window_bounds = array<i64: 5, 6>}, {pipeline_mode = #tpu.pipeline_mode<synchronous>, transform_indices = @transform_10, window_bounds = array<i64: 5, 6>}, {transform_indices = @transform_11, window_bounds = array<i64: 4, 6>}]} {
    %c0 = arith.constant 0 : index
    %c0_0 = arith.constant 0 : index
    %0 = vector.load %arg1[%c0, %c0_0] : memref<4x60xf32, #tpu.memory_space<vmem>>, vector<4x60xf32>
    %c0_1 = arith.constant 0 : index
    %c0_2 = arith.constant 0 : index
    %1 = vector.load %arg2[%c0_1, %c0_2] : memref<60x42xf32, #tpu.memory_space<vmem>>, vector<60x42xf32>
    %c0_3 = arith.constant 0 : index
    %c0_4 = arith.constant 0 : index
    %2 = vector.load %arg3[%c0_3, %c0_4] : memref<1x42xf32, #tpu.memory_space<vmem>>, vector<1x42xf32>
    %cst = arith.constant dense<0.000000e+00> : vector<4x42xf32>
    %3 = tpu.matmul %0, %1, %cst {dimension_numbers = #tpu.dot_dimension_numbers<[1], [0], [0], [1], [0, 0, 1, 1], [], []>} : vector<4x60xf32>, vector<60x42xf32>, vector<4x42xf32> -> vector<4x42xf32>
    %4 = vector.broadcast %2 : vector<1x42xf32> to vector<4x42xf32>
    %5 = arith.addf %3, %4 : vector<4x42xf32>
    %cst_5 = arith.constant 0.000000e+00 : f32
    %6 = vector.broadcast %cst_5 : f32 to vector<4x42xf32>
    %7 = arith.maximumf %5, %6 : vector<4x42xf32>
    %8 = vector.broadcast %cst_5 : f32 to vector<4x42xf32>
    %9 = arith.subf %5, %8 : vector<4x42xf32>
    %10 = arith.cmpf one, %9, %9 : vector<4x42xf32>
    %11 = vector.broadcast %cst_5 : f32 to vector<4x42xf32>
    %12 = arith.addf %5, %11 : vector<4x42xf32>
    %13 = math.absf %9 : vector<4x42xf32>
    %cst_6 = arith.constant 0.000000e+00 : f32
    %14 = vector.broadcast %cst_6 : f32 to vector<4x42xf32>
    %15 = arith.subf %14, %13 : vector<4x42xf32>
    %16 = math.exp %15 : vector<4x42xf32>
    %17 = math.log1p %16 : vector<4x42xf32>
    %18 = arith.addf %7, %17 : vector<4x42xf32>
    %19 = arith.select %10, %12, %18 : vector<4x42xi1>, vector<4x42xf32>
    %c0_7 = arith.constant 0 : index
    %c0_8 = arith.constant 0 : index
    %20 = vector.load %arg4[%c0_7, %c0_8] : memref<42x30xf32, #tpu.memory_space<vmem>>, vector<42x30xf32>
    %c0_9 = arith.constant 0 : index
    %c0_10 = arith.constant 0 : index
    %21 = vector.load %arg5[%c0_9, %c0_10] : memref<1x30xf32, #tpu.memory_space<vmem>>, vector<1x30xf32>
    %cst_11 = arith.constant dense<0.000000e+00> : vector<4x30xf32>
    %22 = tpu.matmul %19, %20, %cst_11 {dimension_numbers = #tpu.dot_dimension_numbers<[1], [0], [0], [1], [0, 0, 1, 1], [], []>} : vector<4x42xf32>, vector<42x30xf32>, vector<4x30xf32> -> vector<4x30xf32>
    %23 = vector.broadcast %21 : vector<1x30xf32> to vector<4x30xf32>
    %24 = arith.addf %22, %23 : vector<4x30xf32>
    %cst_12 = arith.constant 0.000000e+00 : f32
    %25 = vector.broadcast %cst_12 : f32 to vector<4x30xf32>
    %26 = arith.maximumf %24, %25 : vector<4x30xf32>
    %27 = vector.broadcast %cst_12 : f32 to vector<4x30xf32>
    %28 = arith.subf %24, %27 : vector<4x30xf32>
    %29 = arith.cmpf one, %28, %28 : vector<4x30xf32>
    %30 = vector.broadcast %cst_12 : f32 to vector<4x30xf32>
    %31 = arith.addf %24, %30 : vector<4x30xf32>
    %32 = math.absf %28 : vector<4x30xf32>
    %cst_13 = arith.constant 0.000000e+00 : f32
    %33 = vector.broadcast %cst_13 : f32 to vector<4x30xf32>
    %34 = arith.subf %33, %32 : vector<4x30xf32>
    %35 = math.exp %34 : vector<4x30xf32>
    %36 = math.log1p %35 : vector<4x30xf32>
    %37 = arith.addf %26, %36 : vector<4x30xf32>
    %38 = arith.select %29, %31, %37 : vector<4x30xi1>, vector<4x30xf32>
    %c0_14 = arith.constant 0 : index
    %c0_15 = arith.constant 0 : index
    %39 = vector.load %arg6[%c0_14, %c0_15] : memref<30x12xf32, #tpu.memory_space<vmem>>, vector<30x12xf32>
    %c0_16 = arith.constant 0 : index
    %c0_17 = arith.constant 0 : index
    %40 = vector.load %arg7[%c0_16, %c0_17] : memref<1x12xf32, #tpu.memory_space<vmem>>, vector<1x12xf32>
    %cst_18 = arith.constant dense<0.000000e+00> : vector<4x12xf32>
    %41 = tpu.matmul %38, %39, %cst_18 {dimension_numbers = #tpu.dot_dimension_numbers<[1], [0], [0], [1], [0, 0, 1, 1], [], []>} : vector<4x30xf32>, vector<30x12xf32>, vector<4x12xf32> -> vector<4x12xf32>
    %42 = vector.broadcast %40 : vector<1x12xf32> to vector<4x12xf32>
    %43 = arith.addf %41, %42 : vector<4x12xf32>
    %cst_19 = arith.constant 0.000000e+00 : f32
    %44 = vector.broadcast %cst_19 : f32 to vector<4x12xf32>
    %45 = arith.maximumf %43, %44 : vector<4x12xf32>
    %46 = vector.broadcast %cst_19 : f32 to vector<4x12xf32>
    %47 = arith.subf %43, %46 : vector<4x12xf32>
    %48 = arith.cmpf one, %47, %47 : vector<4x12xf32>
    %49 = vector.broadcast %cst_19 : f32 to vector<4x12xf32>
    %50 = arith.addf %43, %49 : vector<4x12xf32>
    %51 = math.absf %47 : vector<4x12xf32>
    %cst_20 = arith.constant 0.000000e+00 : f32
    %52 = vector.broadcast %cst_20 : f32 to vector<4x12xf32>
    %53 = arith.subf %52, %51 : vector<4x12xf32>
    %54 = math.exp %53 : vector<4x12xf32>
    %55 = math.log1p %54 : vector<4x12xf32>
    %56 = arith.addf %45, %55 : vector<4x12xf32>
    %57 = arith.select %48, %50, %56 : vector<4x12xi1>, vector<4x12xf32>
    %c0_21 = arith.constant 0 : index
    %c0_22 = arith.constant 0 : index
    %58 = vector.load %arg8[%c0_21, %c0_22] : memref<12x5xf32, #tpu.memory_space<vmem>>, vector<12x5xf32>
    %c0_23 = arith.constant 0 : index
    %c0_24 = arith.constant 0 : index
    %59 = vector.load %arg9[%c0_23, %c0_24] : memref<1x5xf32, #tpu.memory_space<vmem>>, vector<1x5xf32>
    %cst_25 = arith.constant dense<0.000000e+00> : vector<4x5xf32>
    %60 = tpu.matmul %57, %58, %cst_25 {dimension_numbers = #tpu.dot_dimension_numbers<[1], [0], [0], [1], [0, 0, 1, 1], [], []>} : vector<4x12xf32>, vector<12x5xf32>, vector<4x5xf32> -> vector<4x5xf32>
    %61 = vector.broadcast %59 : vector<1x5xf32> to vector<4x5xf32>
    %62 = arith.addf %60, %61 : vector<4x5xf32>
    %cst_26 = arith.constant 0.000000e+00 : f32
    %63 = vector.broadcast %cst_26 : f32 to vector<4x5xf32>
    %64 = arith.maximumf %62, %63 : vector<4x5xf32>
    %65 = vector.broadcast %cst_26 : f32 to vector<4x5xf32>
    %66 = arith.subf %62, %65 : vector<4x5xf32>
    %67 = arith.cmpf one, %66, %66 : vector<4x5xf32>
    %68 = vector.broadcast %cst_26 : f32 to vector<4x5xf32>
    %69 = arith.addf %62, %68 : vector<4x5xf32>
    %70 = math.absf %66 : vector<4x5xf32>
    %cst_27 = arith.constant 0.000000e+00 : f32
    %71 = vector.broadcast %cst_27 : f32 to vector<4x5xf32>
    %72 = arith.subf %71, %70 : vector<4x5xf32>
    %73 = math.exp %72 : vector<4x5xf32>
    %74 = math.log1p %73 : vector<4x5xf32>
    %75 = arith.addf %64, %74 : vector<4x5xf32>
    %76 = arith.select %67, %69, %75 : vector<4x5xi1>, vector<4x5xf32>
    %c0_28 = arith.constant 0 : index
    %c0_29 = arith.constant 0 : index
    %77 = vector.load %arg10[%c0_28, %c0_29] : memref<5x6xf32, #tpu.memory_space<vmem>>, vector<5x6xf32>
    %cst_30 = arith.constant dense<0.000000e+00> : vector<4x6xf32>
    %78 = tpu.matmul %62, %77, %cst_30 {dimension_numbers = #tpu.dot_dimension_numbers<[1], [0], [0], [1], [0, 0, 1, 1], [], []>} : vector<4x5xf32>, vector<5x6xf32>, vector<4x6xf32> -> vector<4x6xf32>
    %c0_31 = arith.constant 0 : index
    %c0_32 = arith.constant 0 : index
    %79 = vector.load %arg11[%c0_31, %c0_32] : memref<5x6xf32, #tpu.memory_space<vmem>>, vector<5x6xf32>
    %cst_33 = arith.constant dense<0.000000e+00> : vector<4x6xf32>
    %80 = tpu.matmul %76, %79, %cst_33 {dimension_numbers = #tpu.dot_dimension_numbers<[1], [0], [0], [1], [0, 0, 1, 1], [], []>} : vector<4x5xf32>, vector<5x6xf32>, vector<4x6xf32> -> vector<4x6xf32>
    %81 = arith.addf %78, %80 : vector<4x6xf32>
    %c0_34 = arith.constant 0 : index
    %c0_35 = arith.constant 0 : index
    %82 = vector.load %arg12[%c0_34, %c0_35] : memref<4x6xf32, #tpu.memory_space<vmem>>, vector<4x6xf32>
    tpu.vector_store %arg12[%c0_34, %c0_35], %81 {strides = array<i32>} : memref<4x6xf32, #tpu.memory_space<vmem>>, vector<4x6xf32>,
    return
  }
  func.func @transform_0(%arg0: i32) -> (i32, i32) {
    %c0_i32 = arith.constant 0 : i32
    %c0_i32_0 = arith.constant 0 : i32
    return %arg0, %c0_i32 : i32, i32
  }
  func.func @transform_1(%arg0: i32) -> (i32, i32) {
    %c0_i32 = arith.constant 0 : i32
    %c0_i32_0 = arith.constant 0 : i32
    %c0_i32_1 = arith.constant 0 : i32
    return %c0_i32, %c0_i32_0 : i32, i32
  }
  func.func @transform_2(%arg0: i32) -> (i32, i32) {
    %c0_i32 = arith.constant 0 : i32
    %c0_i32_0 = arith.constant 0 : i32
    %c0_i32_1 = arith.constant 0 : i32
    return %c0_i32, %c0_i32_0 : i32, i32
  }
  func.func @transform_3(%arg0: i32) -> (i32, i32) {
    %c0_i32 = arith.constant 0 : i32
    %c0_i32_0 = arith.constant 0 : i32
    %c0_i32_1 = arith.constant 0 : i32
    return %c0_i32, %c0_i32_0 : i32, i32
  }
  func.func @transform_4(%arg0: i32) -> (i32, i32) {
    %c0_i32 = arith.constant 0 : i32
    %c0_i32_0 = arith.constant 0 : i32
    %c0_i32_1 = arith.constant 0 : i32
    return %c0_i32, %c0_i32_0 : i32, i32
  }
  func.func @transform_5(%arg0: i32) -> (i32, i32) {
    %c0_i32 = arith.constant 0 : i32
    %c0_i32_0 = arith.constant 0 : i32
    %c0_i32_1 = arith.constant 0 : i32
    return %c0_i32, %c0_i32_0 : i32, i32
  }
  func.func @transform_6(%arg0: i32) -> (i32, i32) {
    %c0_i32 = arith.constant 0 : i32
    %c0_i32_0 = arith.constant 0 : i32
    %c0_i32_1 = arith.constant 0 : i32
    return %c0_i32, %c0_i32_0 : i32, i32
  }
  func.func @transform_7(%arg0: i32) -> (i32, i32) {
    %c0_i32 = arith.constant 0 : i32
    %c0_i32_0 = arith.constant 0 : i32
    %c0_i32_1 = arith.constant 0 : i32
    return %c0_i32, %c0_i32_0 : i32, i32
  }
  func.func @transform_8(%arg0: i32) -> (i32, i32) {
    %c0_i32 = arith.constant 0 : i32
    %c0_i32_0 = arith.constant 0 : i32
    %c0_i32_1 = arith.constant 0 : i32
    return %c0_i32, %c0_i32_0 : i32, i32
  }
  func.func @transform_9(%arg0: i32) -> (i32, i32) {
    %c0_i32 = arith.constant 0 : i32
    %c0_i32_0 = arith.constant 0 : i32
    %c0_i32_1 = arith.constant 0 : i32
    return %c0_i32, %c0_i32_0 : i32, i32
  }
  func.func @transform_10(%arg0: i32) -> (i32, i32) {
    %c0_i32 = arith.constant 0 : i32
    %c0_i32_0 = arith.constant 0 : i32
    %c0_i32_1 = arith.constant 0 : i32
    return %c0_i32, %c0_i32_0 : i32, i32
  }
  func.func @transform_11(%arg0: i32) -> (i32, i32) {
    %c0_i32 = arith.constant 0 : i32
    %c0_i32_0 = arith.constant 0 : i32
    return %arg0, %c0_i32 : i32, i32
  }
}

</mosaic_0001>

<bundles_post_ra>
// kernel: tpu_custom_call.1
= control target key start
LH: loop header
LB: loop body
LE: loop exit
PB: predicated region body
PF: predicated region fallthrough
CT: control target
= control target key end

     0   :  { %vm56_vm0 = vcmask 1043456   ;;  %s541_s0 = inlined_call_operand.vmem [shape: f32[4,60], index: 0, kind: input, shape index: {}]   ;;  %s542_s1 = inlined_call_operand.vmem [shape: f32[60,42], index: 1, kind: input, shape index: {}]   ;;  %s543_s2 = inlined_call_operand.vmem [shape: f32[1,42], index: 2, kind: input, shape index: {}]   ;;  %s544_s3 = inlined_call_operand.vmem [shape: f32[42,30], index: 3, kind: input, shape index: {}]   ;;  %s545_s4 = inlined_call_operand.vmem [shape: f32[1,30], index: 4, kind: input, shape index: {}]   ;;  %s546_s5 = inlined_call_operand.vmem [shape: f32[30,12], index: 5, kind: input, shape index: {}]   ;;  %s547_s6 = inlined_call_operand.vmem [shape: f32[1,12], index: 6, kind: input, shape index: {}]   ;;  %s548_s7 = inlined_call_operand.vmem [shape: f32[12,5], index: 7, kind: input, shape index: {}]   ;;  %s549_s8 = inlined_call_operand.vmem [shape: f32[1,5], index: 8, kind: input, shape index: {}]   ;;  %s550_s9 = inlined_call_operand.vmem [shape: f32[5,6], index: 9, kind: input, shape index: {}]   ;;  %s551_s10 = inlined_call_operand.vmem [shape: f32[5,6], index: 10, kind: input, shape index: {}]   ;;  %s552_s11 = inlined_call_operand.hbm [shape: f32[4,6], index: 11, kind: output, shape index: {}]  }
   0x1   :  { %v47_v0 = vld [vmem:[%s542_s1 + $0x38] sm:$0xf]  ;;  %v46_v1 = vld [vmem:[%s542_s1 + $0x30] sm:$0xff]  ;;  %v45_v2 = vld [vmem:[%s542_s1 + $0x28] sm:$0xff] }
   0x2   :  { %333 = vmatpush.msk.msra.mxu0 %vm56_vm0, %v47_v0  ;;  %v44_v3 = vld [vmem:[%s542_s1 + $0x20] sm:$0xff] }
   0x4   :  { %69 = vmatpush.msra.mxu0 %v46_v1 }
   0x5   :  { %16 = vsyncpa [#allocation3], 0  ;;  %v43_v4 = vld [vmem:[%s542_s1 + $0x18] sm:$0xff]  ;;  %v42_v5 = vld [vmem:[%s542_s1 + $0x10] sm:$0xff]  ;;  %vm52_vm1 = vcmask 490496   ;;  %vm112_vm2 = vcmask 1041408  }
   0x6   :  { %70 = vmatpush.msra.mxu0 %v45_v2  ;;  %v41_v6 = vld [vmem:[%s542_s1 + $0x8] sm:$0xff]  ;;  %v40_v7 = vld [vmem:[%s542_s1] sm:$0xff]  ;;  %v101_v11 = vld [vmem:[%s544_s3 + $0x18] sm:$0xff]  ;;  %vm108_vm4 = vcmask 343040   ;;  %vm166_vm6 = vcmask 1045504   ;;  %vm162_vm8 = vcmask 244736  }
   0x7   :  { %v39_v8 = vld [vmem:[%s541_s0] sm:$0xf]  ;;  %v103_v9 = vld [vmem:[%s544_s3 + $0x28] sm:$0x3]  ;;  %v100_v12 = vld [vmem:[%s544_s3 + $0x10] sm:$0xff]  ;;  %vm214_vm11 = vcmask 97280  }
   0x8   :  { %71 = vmatpush.msra.mxu0 %v44_v3  ;;  %v102_v10 = vld [vmem:[%s544_s3 + $0x20] sm:$0xff]  ;;  %335 = vmatpush.msk.msra.mxu1 %vm112_vm2, %v103_v9  ;;  %v99_v13 = vld [vmem:[%s544_s3 + $0x8] sm:$0xff]  ;;  %v157_v33 = vld [vmem:[%s546_s5 + $0x18] sm:$0x3f]  ;;  %vm265_vm13 = vcmask 1044480   ;;  %vm261_vm14 = vcmask 39936  }
   0x9   :  { %v98_v14 = vld [vmem:[%s544_s3] sm:$0xff]  ;;  %v156_v34 = vld [vmem:[%s546_s5 + $0x10] sm:$0xff]  ;;  %337 = vmatpush.msk.msra.mxu2 %vm166_vm6, %v157_v33  ;;  %v155_v35 = vld [vmem:[%s546_s5 + $0x8] sm:$0xff]  ;;  %s324_s24 = sshll.u32 %s552_s11, 4  ;;  %s325_s24 = int_to_ptr.hbm [resolvable:$true] %s324_s24 }
   0xa   :  { %72 = vmatpush.msra.mxu0 %v43_v4  ;;  %127 = vmatpush.msra.mxu1 %v102_v10  ;;  %v346_v15 = vld [vmem:[%s543_s2] ss:$0 sm:$0xff]  ;;  %v209_v55 = vld [vmem:[%s548_s7 + $0x8] sm:$0xf] }
   0xb   :  { %183 = vmatpush.msra.mxu2 %v156_v34  ;;  %v154_v36 = vld [vmem:[%s546_s5] sm:$0xff]  ;;  %339 = vmatpush.msk.msra.mxu3 %vm56_vm0, %v209_v55 }
   0xc   :  { %73 = vmatpush.msra.mxu0 %v42_v5  ;;  %128 = vmatpush.msra.mxu1 %v101_v11  ;;  %v347_v37 = vld [vmem:[%s545_s4] ss:$0 sm:$0xff] }
   0xd   :  { %184 = vmatpush.msra.mxu2 %v155_v35  ;;  %v208_v56 = vld [vmem:[%s548_s7] sm:$0xff] }
   0xe   :  { %74 = vmatpush.msra.mxu0 %v41_v6  ;;  %129 = vmatpush.msra.mxu1 %v100_v12  ;;  %v348_v57 = vld [vmem:[%s547_s6] ss:$0 sm:$0xff] }
   0xf   :  { %185 = vmatpush.msra.mxu2 %v154_v36  ;;  %236 = vmatpush.msra.mxu3 %v208_v56  ;;  %v259_v11 = vld [vmem:[%s550_s9] sm:$0x1f] }
  0x10   :  { %75 = vmatpush.msra.mxu0 %v40_v7  ;;  %130 = vmatpush.msra.mxu1 %v99_v13  ;;  %v260_v12 = vld [vmem:[%s551_s10] sm:$0x1f] }
  0x11   :  { %334 = vmatmul.msk.f32.vlgmr.msra.gmra.mxu0 %vm52_vm1, %v39_v8  ;;  %343 = vmatpush.msk.msrb.mxu2 %vm265_vm13, %v259_v11  ;;  %v349_v13 = vld [vmem:[%s549_s8] ss:$0 sm:$0xff]  ;;  %s392_s8 = smov [#allocation2]   ;;  %vm315_vm1 = vcmask 44032  }
  0x12   :  { %131 = vmatpush.msra.mxu1 %v98_v14  ;;  %341 = vmatpush.msk.msrb.mxu3 %vm265_vm13, %v260_v12  ;;  %s322_s9 = sshll.u32 %s392_s8, 4  ;;  %s323_s9 = int_to_ptr.vmem [resolvable:$true] %s322_s9 }
  0x8e   :  { %v77_v16 = vpop.f32.mrf.mxu0 }
  0x8f   :  { %v78_v17 = vadd.f32 %v346_v15, %v77_v16 }
  0x91   :  { %v83_v18 = vand.u32 2147483647, %v78_v17  ;;  %v80_v29 = vmax.f32 %v78_v17, 0.0  ;;  %vm81_vm5 = vcmp.ne.f32.partialorder %v78_v17, %v78_v17 }
  0x93   :  { %v84_v19 = vsub.f32 0.0, %v83_v18 }
  0x95   :  { %v85_v20 = vmul.f32 1.442695, %v84_v19 }
  0x97   :  { %350 = vpow2.f32 %v85_v20 }
  0x9d   :  { %v351_v21 = vpop.eup %350 }
  0x9e   :  { %v87_v22 = vadd.f32 1.0, %v351_v21  ;;  %v90_v23 = vmul.f32 -0.5, %v351_v21  ;;  %v93_v25 = vand.u32 2147483647, %v351_v21 }
  0xa0   :  { %352 = vlog2.f32 %v87_v22  ;;  %v91_v24 = vadd.f32 1.0, %v90_v23  ;;  %vm94_vm3 = vcmp.lt.f32.partialorder %v93_v25, 0.0004427343 }
  0xa2   :  { %v92_v28 = vmul.f32 %v351_v21, %v91_v24 }
  0xa6   :  { %v353_v26 = vpop.eup %352 }
  0xa7   :  { %v89_v27 = vmul.f32 0.6931472, %v353_v26 }
  0xa9   :  { %v95_v30 = vsel %vm94_vm3, %v92_v28, %v89_v27 }
  0xaa   :  { %v96_v31 = vadd.f32 %v95_v30, %v80_v29 }
  0xac   :  { %v97_v32 = vsel %vm81_vm5, %v78_v17, %v96_v31 }
  0xad   :  { %336 = vmatmul.msk.f32.vlgmr.msra.gmra.mxu1 %vm108_vm4, %v97_v32 }
 0x12a   :  { %v133_v38 = vpop.f32.mrf.mxu1 }
 0x12b   :  { %v134_v39 = vadd.f32 %v347_v37, %v133_v38 }
 0x12d   :  { %v139_v40 = vand.u32 2147483647, %v134_v39  ;;  %v136_v51 = vmax.f32 %v134_v39, 0.0  ;;  %vm137_vm9 = vcmp.ne.f32.partialorder %v134_v39, %v134_v39 }
 0x12f   :  { %v140_v41 = vsub.f32 0.0, %v139_v40 }
 0x131   :  { %v141_v42 = vmul.f32 1.442695, %v140_v41 }
 0x133   :  { %354 = vpow2.f32 %v141_v42 }
 0x139   :  { %v355_v43 = vpop.eup %354 }
 0x13a   :  { %v143_v44 = vadd.f32 1.0, %v355_v43  ;;  %v146_v45 = vmul.f32 -0.5, %v355_v43  ;;  %v149_v47 = vand.u32 2147483647, %v355_v43 }
 0x13c   :  { %356 = vlog2.f32 %v143_v44  ;;  %v147_v46 = vadd.f32 1.0, %v146_v45  ;;  %vm150_vm7 = vcmp.lt.f32.partialorder %v149_v47, 0.0004427343 }
 0x13e   :  { %v148_v50 = vmul.f32 %v355_v43, %v147_v46 }
 0x142   :  { %v357_v48 = vpop.eup %356 }
 0x143   :  { %v145_v49 = vmul.f32 0.6931472, %v357_v48 }
 0x145   :  { %v151_v52 = vsel %vm150_vm7, %v148_v50, %v145_v49 }
 0x146   :  { %v152_v53 = vadd.f32 %v151_v52, %v136_v51 }
 0x148   :  { %v153_v54 = vsel %vm137_vm9, %v134_v39, %v152_v53 }
 0x149   :  { %338 = vmatmul.msk.f32.vlgmr.msra.gmra.mxu2 %vm162_vm8, %v153_v54 }
 0x1cc   :  { %v187_v58 = vpop.f32.mrf.mxu2 }
 0x1cd   :  { %v188_v59 = vadd.f32 %v348_v57, %v187_v58 }
 0x1cf   :  { %v193_v60 = vand.u32 2147483647, %v188_v59  ;;  %v190_v7 = vmax.f32 %v188_v59, 0.0  ;;  %vm191_vm12 = vcmp.ne.f32.partialorder %v188_v59, %v188_v59 }
 0x1d1   :  { %v194_v61 = vsub.f32 0.0, %v193_v60 }
 0x1d3   :  { %v195_v62 = vmul.f32 1.442695, %v194_v61 }
 0x1d5   :  { %358 = vpow2.f32 %v195_v62 }
 0x1db   :  { %v359_v63 = vpop.eup %358 }
 0x1dc   :  { %v197_v0 = vadd.f32 1.0, %v359_v63  ;;  %v200_v1 = vmul.f32 -0.5, %v359_v63  ;;  %v203_v3 = vand.u32 2147483647, %v359_v63 }
 0x1de   :  { %360 = vlog2.f32 %v197_v0  ;;  %v201_v2 = vadd.f32 1.0, %v200_v1  ;;  %vm204_vm10 = vcmp.lt.f32.partialorder %v203_v3, 0.0004427343 }
 0x1e0   :  { %v202_v6 = vmul.f32 %v359_v63, %v201_v2 }
 0x1e4   :  { %v361_v4 = vpop.eup %360 }
 0x1e5   :  { %v199_v5 = vmul.f32 0.6931472, %v361_v4 }
 0x1e7   :  { %v205_v8 = vsel %vm204_vm10, %v202_v6, %v199_v5 }
 0x1e8   :  { %v206_v9 = vadd.f32 %v205_v8, %v190_v7 }
 0x1ea   :  { %v207_v10 = vsel %vm191_vm12, %v188_v59, %v206_v9 }
 0x1eb   :  { %340 = vmatmul.msk.f32.vlgmr.msra.gmra.mxu3 %vm214_vm11, %v207_v10 }
 0x26e   :  { %v238_v14 = vpop.f32.mrf.mxu3 }
 0x26f   :  { %v239_v15 = vadd.f32 %v349_v13, %v238_v14 }
 0x271   :  { %v244_v16 = vand.u32 2147483647, %v239_v15  ;;  %344 = vmatmul.msk.f32.vlgmr.msrb.gmra.mxu2 %vm261_vm14, %v239_v15  ;;  %v241_v27 = vmax.f32 %v239_v15, 0.0  ;;  %vm242_vm0 = vcmp.ne.f32.partialorder %v239_v15, %v239_v15 }
 0x273   :  { %v245_v17 = vsub.f32 0.0, %v244_v16 }
 0x275   :  { %v246_v18 = vmul.f32 1.442695, %v245_v17 }
 0x277   :  { %362 = vpow2.f32 %v246_v18 }
 0x27d   :  { %v363_v19 = vpop.eup %362 }
 0x27e   :  { %v248_v20 = vadd.f32 1.0, %v363_v19  ;;  %v251_v21 = vmul.f32 -0.5, %v363_v19  ;;  %v254_v23 = vand.u32 2147483647, %v363_v19 }
 0x280   :  { %364 = vlog2.f32 %v248_v20  ;;  %v252_v22 = vadd.f32 1.0, %v251_v21  ;;  %vm255_vm15 = vcmp.lt.f32.partialorder %v254_v23, 0.0004427343 }
 0x282   :  { %v253_v26 = vmul.f32 %v363_v19, %v252_v22 }
 0x286   :  { %v365_v24 = vpop.eup %364 }
 0x287   :  { %v250_v25 = vmul.f32 0.6931472, %v365_v24 }
 0x289   :  { %v256_v28 = vsel %vm255_vm15, %v253_v26, %v250_v25 }
 0x28a   :  { %v257_v29 = vadd.f32 %v256_v28, %v241_v27 }
 0x28c   :  { %v258_v30 = vsel %vm242_vm0, %v239_v15, %v257_v29 }
 0x28d   :  { %342 = vmatmul.msk.f32.vlgmr.msrb.gmra.mxu3 %vm261_vm14, %v258_v30 }
 0x2f4   :  { %v312_v31 = vpop.f32.mrf.mxu2 }
 0x310   :  { %v286_v32 = vpop.f32.mrf.mxu3 }
 0x311   :  { %v313_v33 = vadd.f32 %v312_v31, %v286_v32 }
 0x313   :  { %316 = vst.msk [vmem:[#allocation2] sm:$0xf] %vm315_vm1, %v313_v33 }
 0x314   :  { %327 = dma.vmem_to_hbm [thread:$0]  %s323_s9, 64, %s325_s24, [#allocation3]  }
 0x315   :  { %390 = dma.done.wait [#allocation3], 64  }
 0x316   :  { %391 = vsyncadd [#allocation3], 4294967232 }
 0x317   :  { %332 = vsyncpa [#allocation3], 1 }

</bundles_post_ra>
